<compile_context>
chip_gen: v7x
topology: tpu7x:2x2x1
jax: 0.10.0
libtpu: 0.0.40
codegen_flags: <defaults>
</compile_context>

<pallas_src>
import functools

import jax
import jax.numpy as jnp
from jax.experimental import pallas as pl
from jax.experimental.pallas import tpu as pltpu

EPS = 1e-5
_LANE = 128


def _round_up(x, m):
    return (x + m - 1) // m * m


def _tpu_vmem_bytes():
    """Per-core VMEM capacity; conservative (v7x-sized) fallback if unknown."""
    try:
        v = int(pltpu.get_tpu_info().vmem_capacity_bytes)
        if v >= (16 << 20):
            return v
    except Exception:
        pass
    return 64 << 20


# --------------------------------------------------------------------------
# Single-pass kernel: whole batch resident for one channel tile (2 HBM passes).
# --------------------------------------------------------------------------
def _bn1d_fused_kernel(x_ref, gamma_ref, beta_ref, o_ref, *, n_rows):
    # x_ref: (N, tc); gamma/beta: (1, tc).
    x = x_ref[...].astype(jnp.float32)
    inv_n = 1.0 / n_rows
    mean = jnp.sum(x, axis=0, keepdims=True) * inv_n
    centered = x - mean
    var = jnp.sum(centered * centered, axis=0, keepdims=True) * inv_n
    a = gamma_ref[...].astype(jnp.float32) * jax.lax.rsqrt(var + EPS)
    # Reuse `centered` for the output (no second traversal of x).
    o_ref[...] = (centered * a + beta_ref[...].astype(jnp.float32)).astype(o_ref.dtype)


def _bn1d_single_pass(x, gamma2, beta2, max_tile_elems, vmem_cap):
    n, c = x.shape
    c128 = _round_up(c, _LANE)
    if c <= _LANE:
        tc = c  # full-dim block: always a legal layout
    else:
        max_tc = max(_LANE, (max_tile_elems // n) // _LANE * _LANE)
        tc = min(max_tc, c128)
        if tc >= c128 and c128 >= 2 * _LANE:
            # Whole array fits one tile: split channels so both v7x cores work.
            tc = _round_up(c128 // 2, _LANE)

    return pl.pallas_call(
        functools.partial(_bn1d_fused_kernel, n_rows=n),
        out_shape=jax.ShapeDtypeStruct((n, c), x.dtype),
        grid=(pl.cdiv(c, tc),),
        in_specs=[
            pl.BlockSpec((n, tc), lambda j: (0, j)),
            pl.BlockSpec((1, tc), lambda j: (0, j)),
            pl.BlockSpec((1, tc), lambda j: (0, j)),
        ],
        out_specs=pl.BlockSpec((n, tc), lambda j: (0, j)),
        compiler_params=pltpu.CompilerParams(
            dimension_semantics=("parallel",),
            vmem_limit_bytes=vmem_cap,
        ),
    )(x, gamma2, beta2)


# --------------------------------------------------------------------------
# Two-pass streaming kernels for large N (3 HBM passes).
# --------------------------------------------------------------------------
def _bn1d_stats_kernel(x_ref, x0_ref, s1_ref, s2_ref, *, n_valid, tn):
    # grid = (channel tiles, batch tiles); batch (reduction) axis last.
    i = pl.program_id(1)

    @pl.when(i == 0)
    def _init():
        s1_ref[...] = jnp.zeros_like(s1_ref)
        s2_ref[...] = jnp.zeros_like(s2_ref)

    x = x_ref[...].astype(jnp.float32)
    x0 = x0_ref[...].astype(jnp.float32)
    # Mask rows beyond N (ragged last batch tile) — no wrapper-side padding.
    rows = jax.lax.broadcasted_iota(jnp.int32, x.shape, 0) + i * tn
    d = jnp.where(rows < n_valid, x - x0, 0.0)  # shifted for numerical stability
    s1_ref[...] += jnp.sum(d, axis=0, keepdims=True)
    s2_ref[...] += jnp.sum(d * d, axis=0, keepdims=True)


def _bn1d_apply_kernel(x_ref, a_ref, b_ref, o_ref):
    o_ref[...] = (
        x_ref[...].astype(jnp.float32) * a_ref[...] + b_ref[...]
    ).astype(o_ref.dtype)


def _bn1d_two_pass(x, gamma2, beta2, max_tile_elems, vmem_cap, sub):
    n, c = x.shape
    c128 = _round_up(c, _LANE)

    # Prefer full-width row slabs (fully contiguous HBM DMA, a/b VMEM-resident).
    if c * sub <= max_tile_elems:
        tc = c
    else:
        tc = max(_LANE, min(((max_tile_elems // 256) // _LANE) * _LANE, c128))
    tn = max(sub, min(max_tile_elems // tc, 1024) // sub * sub)
    tn = min(tn, _round_up(n, sub))

    c_tiles = pl.cdiv(c, tc)
    n_tiles = pl.cdiv(n, tn)

    x0 = x[:1, :]  # per-channel shift point (first row) — tiny (1, C) slice

    # Pass 1: per-channel shifted sum / sum-of-squares.
    sums, sumsqs = pl.pallas_call(
        functools.partial(_bn1d_stats_kernel, n_valid=n, tn=tn),
        out_shape=(
            jax.ShapeDtypeStruct((1, c), jnp.float32),
            jax.ShapeDtypeStruct((1, c), jnp.float32),
        ),
        grid=(c_tiles, n_tiles),
        in_specs=[
            pl.BlockSpec((tn, tc), lambda j, i: (i, j)),
            pl.BlockSpec((1, tc), lambda j, i: (0, j)),
        ],
        out_specs=(
            pl.BlockSpec((1, tc), lambda j, i: (0, j)),
            pl.BlockSpec((1, tc), lambda j, i: (0, j)),
        ),
        compiler_params=pltpu.CompilerParams(
            dimension_semantics=("parallel", "arbitrary"),
            vmem_limit_bytes=vmem_cap,
        ),
    )(x, x0)

    # Tiny (1, C) per-channel math between passes (negligible cost).
    inv_n = 1.0 / n
    x0f = x0.astype(jnp.float32)
    m_shift = sums * inv_n                      # mean of (x - x0)
    mean = x0f + m_shift
    var = jnp.maximum(sumsqs * inv_n - m_shift * m_shift, 0.0)
    a = gamma2.astype(jnp.float32) * jax.lax.rsqrt(var + EPS)
    b = beta2.astype(jnp.float32) - mean * a

    # Pass 2: y = x * a + b, fully parallel over both tile axes.
    return pl.pallas_call(
        _bn1d_apply_kernel,
        out_shape=jax.ShapeDtypeStruct((n, c), x.dtype),
        grid=(c_tiles, n_tiles),
        in_specs=[
            pl.BlockSpec((tn, tc), lambda j, i: (i, j)),
            pl.BlockSpec((1, tc), lambda j, i: (0, j)),
            pl.BlockSpec((1, tc), lambda j, i: (0, j)),
        ],
        out_specs=pl.BlockSpec((tn, tc), lambda j, i: (i, j)),
        compiler_params=pltpu.CompilerParams(
            dimension_semantics=("parallel", "parallel"),
            vmem_limit_bytes=vmem_cap,
        ),
    )(x, a, b)


# --------------------------------------------------------------------------
# Wrapper
# --------------------------------------------------------------------------
def batchnorm1d_forward(x, gamma, beta, *, force_two_pass=False):
    """x: (N, C); gamma, beta: (C,). Returns BatchNorm1d training-mode output."""
    n, c = x.shape
    isz = jnp.dtype(x.dtype).itemsize
    sub = max(8, 32 // isz)                     # dtype-aware sublane multiple

    vmem = _tpu_vmem_bytes()
    vmem_cap = (vmem * 4) // 5                  # ~102 MiB on v5e/v6e, ~51 MiB on v7x
    # Per-tile element budget for the fused single-pass kernel:
    #   2x (in + out) double-buffered tiles + ~2 f32 working tiles per element.
    max_tile_elems = max(128 * sub, (vmem_cap - (8 << 20)) // (4 * isz + 8))

    gamma2 = gamma.reshape(1, c)
    beta2 = beta.reshape(1, c)

    # Single pass (one less HBM traversal) whenever a full-batch 128-lane (or
    # full-C) channel tile fits the per-buffer budget.
    use_single = (not force_two_pass) and (n * min(c, _LANE) <= max_tile_elems)
    if use_single:
        return _bn1d_single_pass(x, gamma2, beta2, max_tile_elems, vmem_cap)
    return _bn1d_two_pass(x, gamma2, beta2, max_tile_elems, vmem_cap, sub)


def _reference_bn1d(x, gamma, beta):
    mean = jnp.mean(x, axis=0, keepdims=True)
    var = jnp.mean((x - mean) ** 2, axis=0, keepdims=True)  # biased, like PyTorch training
    return (x - mean) / jnp.sqrt(var + EPS) * gamma[None, :] + beta[None, :]


if __name__ == "__main__":
    key = jax.random.PRNGKey(0)
    batch = 8
    input_dim = 32

    x = jax.random.normal(key, (batch, input_dim), dtype=jnp.float32)
    # nn.BatchNorm1d default affine params: weight = ones, bias = zeros.
    gamma = jnp.ones((input_dim,), dtype=jnp.float32)
    beta = jnp.zeros((input_dim,), dtype=jnp.float32)

    ref = _reference_bn1d(x, gamma, beta)

    out = jax.block_until_ready(batchnorm1d_forward(x, gamma, beta))
    assert out.shape == (batch, input_dim)
    assert jnp.allclose(out, ref, atol=1e-4, rtol=1e-4)

    # Also exercise the streaming (large-N) two-pass path at this small shape.
    out2 = jax.block_until_ready(
        batchnorm1d_forward(x, gamma, beta, force_two_pass=True)
    )
    assert jnp.allclose(out2, ref, atol=1e-4, rtol=1e-4)

    print("KERNEL_OK")
</pallas_src>

<mosaic_0001>
module attributes {stable_mosaic.version = 11 : i64} {
  func.func @_bn1d_fused_kernel(%arg0: i32, %arg1: memref<8x32xf32, #tpu.memory_space<vmem>>, %arg2: memref<1x32xf32, #tpu.memory_space<vmem>>, %arg3: memref<1x32xf32, #tpu.memory_space<vmem>>, %arg4: memref<8x32xf32, #tpu.memory_space<vmem>>) attributes {dimension_semantics = [#tpu.dimension_semantics<parallel>], iteration_bounds = array<i64: 1>, scalar_prefetch = 0 : i64, scratch_operands = 0 : i64, tpu.core_type = #tpu.core_type<tc>, window_params = [{transform_indices = @transform_0, window_bounds = array<i64: 8, 32>}, {transform_indices = @transform_1, window_bounds = array<i64: 1, 32>}, {transform_indices = @transform_2, window_bounds = array<i64: 1, 32>}, {transform_indices = @transform_3, window_bounds = array<i64: 8, 32>}]} {
    %c0 = arith.constant 0 : index
    %c0_0 = arith.constant 0 : index
    %0 = vector.load %arg1[%c0, %c0_0] : memref<8x32xf32, #tpu.memory_space<vmem>>, vector<8x32xf32>
    %cst = arith.constant dense<0.000000e+00> : vector<32xf32>
    %1 = vector.multi_reduction <add>, %0, %cst [0] : vector<8x32xf32> to vector<32xf32>
    %2 = vector.shape_cast %1 : vector<32xf32> to vector<1x32xf32>
    %cst_1 = arith.constant 1.250000e-01 : f32
    %3 = vector.broadcast %cst_1 : f32 to vector<1x32xf32>
    %4 = arith.mulf %2, %3 : vector<1x32xf32>
    %5 = vector.broadcast %4 : vector<1x32xf32> to vector<8x32xf32>
    %6 = arith.subf %0, %5 : vector<8x32xf32>
    %7 = arith.mulf %6, %6 : vector<8x32xf32>
    %cst_2 = arith.constant dense<0.000000e+00> : vector<32xf32>
    %8 = vector.multi_reduction <add>, %7, %cst_2 [0] : vector<8x32xf32> to vector<32xf32>
    %9 = vector.shape_cast %8 : vector<32xf32> to vector<1x32xf32>
    %cst_3 = arith.constant 1.250000e-01 : f32
    %10 = vector.broadcast %cst_3 : f32 to vector<1x32xf32>
    %11 = arith.mulf %9, %10 : vector<1x32xf32>
    %c0_4 = arith.constant 0 : index
    %c0_5 = arith.constant 0 : index
    %12 = vector.load %arg2[%c0_4, %c0_5] : memref<1x32xf32, #tpu.memory_space<vmem>>, vector<1x32xf32>
    %cst_6 = arith.constant 9.99999974E-6 : f32
    %13 = vector.broadcast %cst_6 : f32 to vector<1x32xf32>
    %14 = arith.addf %11, %13 : vector<1x32xf32>
    %15 = math.rsqrt %14 : vector<1x32xf32>
    %16 = arith.mulf %12, %15 : vector<1x32xf32>
    %17 = vector.broadcast %16 : vector<1x32xf32> to vector<8x32xf32>
    %18 = arith.mulf %6, %17 : vector<8x32xf32>
    %c0_7 = arith.constant 0 : index
    %c0_8 = arith.constant 0 : index
    %19 = vector.load %arg3[%c0_7, %c0_8] : memref<1x32xf32, #tpu.memory_space<vmem>>, vector<1x32xf32>
    %20 = vector.broadcast %19 : vector<1x32xf32> to vector<8x32xf32>
    %21 = arith.addf %18, %20 : vector<8x32xf32>
    %c0_9 = arith.constant 0 : index
    %c0_10 = arith.constant 0 : index
    %22 = vector.load %arg4[%c0_9, %c0_10] : memref<8x32xf32, #tpu.memory_space<vmem>>, vector<8x32xf32>
    tpu.vector_store %arg4[%c0_9, %c0_10], %21 {strides = array<i32>} : memref<8x32xf32, #tpu.memory_space<vmem>>, vector<8x32xf32>,
    return
  }
  func.func @transform_0(%arg0: i32) -> (i32, i32) {
    %c0_i32 = arith.constant 0 : i32
    %c0_i32_0 = arith.constant 0 : i32
    return %c0_i32, %arg0 : i32, i32
  }
  func.func @transform_1(%arg0: i32) -> (i32, i32) {
    %c0_i32 = arith.constant 0 : i32
    %c0_i32_0 = arith.constant 0 : i32
    return %c0_i32, %arg0 : i32, i32
  }
  func.func @transform_2(%arg0: i32) -> (i32, i32) {
    %c0_i32 = arith.constant 0 : i32
    %c0_i32_0 = arith.constant 0 : i32
    return %c0_i32, %arg0 : i32, i32
  }
  func.func @transform_3(%arg0: i32) -> (i32, i32) {
    %c0_i32 = arith.constant 0 : i32
    %c0_i32_0 = arith.constant 0 : i32
    return %c0_i32, %arg0 : i32, i32
  }
}

</mosaic_0001>

<bundles_post_ra>
// kernel: tpu_custom_call.1
= control target key start
LH: loop header
LB: loop body
LE: loop exit
PB: predicated region body
PF: predicated region fallthrough
CT: control target
= control target key end

     0   :  { %8 = vsyncpa [#allocation3], 0  ;;  %s190_s0 = inlined_call_operand.hbm [shape: f32[8,32], index: 0, kind: input, shape index: {}]   ;;  %s191_s1 = inlined_call_operand.vmem [shape: f32[1,32], index: 1, kind: input, shape index: {}]   ;;  %s192_s2 = inlined_call_operand.vmem [shape: f32[1,32], index: 2, kind: input, shape index: {}]   ;;  %s193_s3 = inlined_call_operand.hbm [shape: f32[8,32], index: 3, kind: output, shape index: {}]  }
   0x1   :  { %9 = vsyncpa [#allocation4], 0  ;;  %s135_s12 = smov [#allocation2]   ;;  %s87_s16 = scalar_lea.hbm %s190_s0, 128 }
   0x2   :  { %s16_s13 = sshll.u32 %s135_s12, 4  ;;  %p88_p0 = scmp.ne.s32.totalorder %s190_s0, %s87_s16  ;;  %s17_s13 = int_to_ptr.vmem [resolvable:$true] %s16_s13 }
   0x3   :  { %p91_p1 = scmp.lt.u32.totalorder %s87_s16, %s190_s0 }
   0x5   :  { %p93_p2 = pnand %p91_p1, %p88_p0 }
   0x7   :  { %96 = shalt.err (!%p93_p2)
}
   0x8   :  { %s97_s21 = scalar_lea.vmem %s17_s13, 128  ;;  %p102_p4 = scmp.lt.s32.totalorder %s17_s13, %s17_s13 }
   0x9   :  { %p98_p3 = scmp.ne.s32.totalorder %s17_s13, %s97_s21  ;;  %p103_p5 = scmp.lt.s32.totalorder %s97_s21, %s97_s21 }
   0xb   :  { %p104_p6 = por %p103_p5, %p102_p4 }
   0xd   :  { %p105_p7 = pnand %p104_p6, %p98_p3 }
   0xf   :  { %108 = shalt.err (!%p105_p7)
}
  0x10   :  { %19 = dma.hbm_to_vmem [thread:$0]  %s190_s0, 128, %s17_s13, [#allocation3]  }
  0x11   :  { %131 = dma.done.wait [#allocation3], 128  }
  0x12   :  { %132 = vsyncadd [#allocation3], 4294967168  ;;  %vm28_vm0 = vcmask 261120   ;;  %v27_v0 = vld [vmem:[#allocation2] sm:$0xff]  ;;  %v52_v20 = vlaneseq  ;;  %s136_s27 = smov [#allocation5]  }
  0x13   :  { %v29_v1 = vsel %vm28_vm0, %v27_v0, 0.0  ;;  %v47_v22 = vld [vmem:[%s191_s1] sm:$0x1]  ;;  %s73_s28 = sshll.u32 %s136_s27, 4  ;;  %s74_s28 = int_to_ptr.vmem [resolvable:$true] %s73_s28 }
  0x14   :  { %v30_v2 = vrot.slane %v29_v1, 4  ;;  %v53_v21 = vshrl.u32 %v52_v20, 7  ;;  %v82_v27 = vld [vmem:[%s192_s2] ss:$0 sm:$0xff]  ;;  %s109_s29 = scalar_lea.vmem %s74_s28, 128  ;;  %p114_p9 = scmp.lt.s32.totalorder %s74_s28, %s74_s28 }
  0x15   :  { %p110_p8 = scmp.ne.s32.totalorder %s74_s28, %s109_s29  ;;  %p115_p10 = scmp.lt.s32.totalorder %s109_s29, %s109_s29 }
  0x16   :  { %v31_v3 = vadd.f32 %v30_v2, %v29_v1  ;;  %v54_v23 = vsub.s32 0, %v53_v21 }
  0x17   :  { %p116_p11 = por %p115_p10, %p114_p9 }
  0x18   :  { %v32_v4 = vrot.slane %v31_v3, 2 }
  0x19   :  { %p117_p12 = pnand %p116_p11, %p110_p8 }
  0x1a   :  { %v33_v5 = vadd.f32 %v32_v4, %v31_v3 }
  0x1c   :  { %v34_v6 = vrot.slane %v33_v5, 1 }
  0x1e   :  { %v35_v7 = vadd.f32 %v34_v6, %v33_v5 }
  0x20   :  { %v36_v8 = vmul.f32 0.125, %v35_v7 }
  0x22   :  { %v37_v9 = vsub.f32 %v27_v0, %v36_v8 }
  0x24   :  { %v38_v10 = vmul.f32 %v37_v9, %v37_v9 }
  0x26   :  { %v39_v11 = vsel %vm28_vm0, %v38_v10, 0.0 }
  0x27   :  { %v40_v12 = vrot.slane %v39_v11, 4 }
  0x29   :  { %v41_v13 = vadd.f32 %v40_v12, %v39_v11 }
  0x2b   :  { %v42_v14 = vrot.slane %v41_v13, 2 }
  0x2d   :  { %v43_v15 = vadd.f32 %v42_v14, %v41_v13 }
  0x2f   :  { %v44_v16 = vrot.slane %v43_v15, 1 }
  0x31   :  { %v45_v17 = vadd.f32 %v44_v16, %v43_v15 }
  0x33   :  { %v46_v18 = vmul.f32 0.125, %v45_v17 }
  0x35   :  { %v48_v19 = vadd.f32 1e-05, %v46_v18 }
  0x37   :  { %85 = vrsqrt.f32 %v48_v19 }
  0x41   :  { %v86_v24 = vpop.eup %85 }
  0x42   :  { %v50_v25 = vmul.f32 %v86_v24, %v47_v22 }
  0x44   :  { %v55_v26 = vrot.slane %v50_v25, %v54_v23 }
  0x46   :  { %v57_v28 = vmul.f32 %v55_v26, %v37_v9 }
  0x48   :  { %v65_v29 = vadd.f32 %v82_v27, %v57_v28 }
  0x4a   :  { %66 = vst.msk [vmem:[#allocation5] sm:$0xff] %vm28_vm0, %v65_v29 }
  0x4b   :  { %120 = shalt.err (!%p117_p12)
}
  0x4c   :  { %s121_s4 = scalar_lea.hbm %s193_s3, 128 }
  0x4d   :  { %p122_p13 = scmp.ne.s32.totalorder %s193_s3, %s121_s4  ;;  %p125_p0 = scmp.lt.u32.totalorder %s121_s4, %s193_s3 }
  0x4f   :  { %p127_p1 = pnand %p125_p0, %p122_p13 }
  0x51   :  { %130 = shalt.err (!%p127_p1)
}
  0x52   :  { %76 = dma.vmem_to_hbm [thread:$0]  %s74_s28, 128, %s193_s3, [#allocation4]  }
  0x53   :  { %133 = dma.done.wait [#allocation4], 128  }
  0x54   :  { %134 = vsyncadd [#allocation4], 4294967168 }
  0x55   :  { %80 = vsyncpa [#allocation3], 1 }
  0x56   :  { %81 = vsyncpa [#allocation4], 1 }

</bundles_post_ra>
